<compile_context>
chip_gen: v5e
topology: v5e:2x2
jax: 0.10.0
libtpu: 0.0.40
codegen_flags: <defaults>
</compile_context>

<pallas_src>
import math
from functools import partial

import jax
import jax.numpy as jnp
from jax.experimental import pallas as pl
from jax.experimental.pallas import tpu as pltpu


def _critic_kernel(x_ref, w1_ref, b1_ref, w2_ref, b2_ref, wv_ref, bv_ref,
                   out_ref, *, pack, width):
    """One batch tile of v = fc_v(relu(fc2(relu(fc1(x))))), `pack` rows/lane-group."""
    # f32 state straight from HBM (single pass); bf16 cast is a VPU op hidden
    # under the MXU instead of a separate HBM round trip in the wrapper.
    x = x_ref[...].astype(jnp.bfloat16)                                  # (R, pack*S)
    # fc1 + relu (MXU, f32 accumulation, f32 bias add).  Block-diagonal packed
    # weights fold `pack` batch rows onto one MXU row -> pack-x fewer pushes.
    h1 = jnp.dot(x, w1_ref[...], preferred_element_type=jnp.float32)     # (R, pack*W)
    h1 = jnp.maximum(h1 + b1_ref[...], 0.0)
    # fc2 + relu
    h2 = jnp.dot(h1.astype(jnp.bfloat16), w2_ref[...],
                 preferred_element_type=jnp.float32)                     # (R, pack*W)
    h2 = jnp.maximum(h2 + b2_ref[...], 0.0)
    # Value head (out_features = 1 per original row): a matmul would add a 3rd
    # MXU pass for a 1..4-wide N, so do it on the VPU (mul) + XLU (lane
    # reductions per 'width'-lane group) -- those slots are idle here.
    prod = h2 * wv_ref[...]                                              # (R, pack*W)
    cols = [jnp.sum(prod[:, g * width:(g + 1) * width], axis=-1, keepdims=True)
            for g in range(pack)]
    v = cols[0] if pack == 1 else jnp.concatenate(cols, axis=-1)         # (R, pack)
    out_ref[...] = (v + bv_ref[0, 0]).astype(out_ref.dtype)


def _round_up(x, m):
    return ((x + m - 1) // m) * m


def critic_forward(state, params, *, pack=4, block_rows=1024):
    """state: (B, state_dim) float32.  Returns (B, 1) float32 (matches PyTorch).

    pack:       batch rows packed side-by-side on the MXU lane axis via
                block-diagonal weights.  Use 4 on v6e/v7x (256-wide MXU),
                2 on v5e (128-wide MXU), 1 to disable packing.
    block_rows: packed rows per grid step (= block_rows * pack original rows).
    """
    B, S = state.shape
    W = params["w1"].shape[1]
    assert pack >= 1
    assert block_rows >= 8 and block_rows % 8 == 0

    # ---- wrapper-side prep (tiny weights / free contiguous reshapes) -------
    B_pad = _round_up(B, pack)
    x = state if B_pad == B else jnp.pad(state, ((0, B_pad - B), (0, 0)))
    rows_total = B_pad // pack
    # (B_pad, S) -> (rows, pack*S) is a row-major contiguous reshape: no copy.
    x = x.reshape(rows_total, pack * S)          # stays f32; cast happens in-kernel

    # Block-diagonal packed weights (tiny: <300 KiB; VMEM-resident all grid).
    eye = jnp.eye(pack, dtype=params["w1"].dtype)
    w1 = jnp.kron(eye, params["w1"]).astype(jnp.bfloat16)       # (pack*S, pack*W)
    w2 = jnp.kron(eye, params["w2"]).astype(jnp.bfloat16)       # (pack*W, pack*W)
    b1 = jnp.tile(params["b1"].astype(jnp.float32), (1, pack))  # (1, pack*W)
    b2 = jnp.tile(params["b2"].astype(jnp.float32), (1, pack))  # (1, pack*W)
    wv = jnp.tile(params["wv"].astype(jnp.float32), (1, pack))  # (1, pack*W)
    bv = params["bv"].astype(jnp.float32)                       # (1, 1) -> SMEM

    # ---- tile selection -----------------------------------------------------
    if rows_total <= 16:
        tile_rows = rows_total                   # single tiny block (= full dims)
    else:
        # At least 2 grid steps so both v7x TensorCores get work under
        # dimension_semantics=("parallel",); capped by block_rows; 8-sublane
        # aligned so the (8,128) block constraint holds for partial coverage.
        tile_rows = min(block_rows, _round_up(pl.cdiv(rows_total, 2), 8))
        tile_rows = min(tile_rows, rows_total)
    grid = (pl.cdiv(rows_total, tile_rows),)

    in_specs = [
        # packed state: tiled over the batch, double-buffered by the pipeliner
        pl.BlockSpec((tile_rows, pack * S), lambda i: (i, 0)),
        # weights / biases: constant block index -> DMA'd once, VMEM-resident
        pl.BlockSpec((pack * S, pack * W), lambda i: (0, 0)),    # w1'
        pl.BlockSpec((1, pack * W), lambda i: (0, 0)),           # b1'
        pl.BlockSpec((pack * W, pack * W), lambda i: (0, 0)),    # w2'
        pl.BlockSpec((1, pack * W), lambda i: (0, 0)),           # b2'
        pl.BlockSpec((1, pack * W), lambda i: (0, 0)),           # wv'
        pl.BlockSpec((1, 1), lambda i: (0, 0),
                     memory_space=pltpu.MemorySpace.SMEM),       # bv scalar
    ]
    out_spec = pl.BlockSpec((tile_rows, pack), lambda i: (i, 0))

    out = pl.pallas_call(
        partial(_critic_kernel, pack=pack, width=W),
        out_shape=jax.ShapeDtypeStruct((rows_total, pack), jnp.float32),
        grid=grid,
        in_specs=in_specs,
        out_specs=out_spec,
        compiler_params=pltpu.CompilerParams(
            # batch tiles are independent -> megacore-shard on v7x (2 TCs)
            dimension_semantics=("parallel",),
            # actual footprint is a few MiB; keep the scheduler honest
            vmem_limit_bytes=16 * 1024 * 1024,
        ),
    )(x, w1, b1, w2, b2, wv, bv)

    # (rows, pack) -> (B_pad, 1) is again a free row-major reshape.
    return out.reshape(B_pad, 1)[:B]


def init_critic_params(key, state_dim, net_width):
    """PyTorch nn.Linear default init: U(-1/sqrt(fan_in), 1/sqrt(fan_in))."""
    def linear(k, fan_in, fan_out):
        kw, kb = jax.random.split(k)
        bound = 1.0 / math.sqrt(fan_in)
        w = jax.random.uniform(kw, (fan_in, fan_out), jnp.float32, -bound, bound)
        b = jax.random.uniform(kb, (1, fan_out), jnp.float32, -bound, bound)
        return w, b

    k1, k2, k3 = jax.random.split(key, 3)
    w1, b1 = linear(k1, state_dim, net_width)
    w2, b2 = linear(k2, net_width, net_width)
    wv_col, bv = linear(k3, net_width, 1)
    return {"w1": w1, "b1": b1, "w2": w2, "b2": b2,
            "wv": wv_col.reshape(1, net_width), "bv": bv}


def critic_reference(state, p):
    """Pure-JAX reference mirroring the kernel's bf16-input / f32-accum math."""
    hi = jax.lax.Precision.HIGHEST
    f32 = jnp.float32
    x = state.astype(jnp.bfloat16).astype(f32)
    w1 = p["w1"].astype(jnp.bfloat16).astype(f32)
    w2 = p["w2"].astype(jnp.bfloat16).astype(f32)
    h1 = jnp.maximum(jnp.dot(x, w1, precision=hi) + p["b1"], 0.0)
    h1 = h1.astype(jnp.bfloat16).astype(f32)
    h2 = jnp.maximum(jnp.dot(h1, w2, precision=hi) + p["b2"], 0.0)
    return jnp.sum(h2 * p["wv"], axis=-1, keepdims=True) + p["bv"]


if __name__ == "__main__":
    STATE_DIM, NET_WIDTH = 16, 64

    key = jax.random.PRNGKey(0)
    k_params, k1, k2, k3 = jax.random.split(key, 4)
    params = init_critic_params(k_params, STATE_DIM, NET_WIDTH)

    def check(state, **kw):
        out = jax.block_until_ready(critic_forward(state, params, **kw))
        ref = critic_reference(state, params)
        assert out.shape == (state.shape[0], 1), out.shape
        err = float(jnp.max(jnp.abs(out - ref)))
        assert jnp.allclose(out, ref, atol=1e-3, rtol=1e-3), err

    # Small batch, not a multiple of the pack factor (exercises the pad path).
    check(jax.random.normal(k1, (10, STATE_DIM), dtype=jnp.float32))
    # Medium batch: >= 2 grid steps (megacore path on v7x).
    check(jax.random.normal(k2, (1024, STATE_DIM), dtype=jnp.float32))
    # Ragged grid: 250 packed rows with 64-row tiles -> partial final block.
    check(jax.random.normal(k3, (1000, STATE_DIM), dtype=jnp.float32),
          block_rows=64)

    # TODO(synk): torch.optim.Adam update step is training-time state, not part
    # of the forward pass, and is not implemented here.
    print("KERNEL_OK")
</pallas_src>

<mosaic_0001>
module attributes {stable_mosaic.version = 11 : i64} {
  func.func @_critic_kernel(%arg0: i32, %arg1: memref<3x64xf32, #tpu.memory_space<vmem>>, %arg2: memref<64x256xbf16, #tpu.memory_space<vmem>>, %arg3: memref<1x256xf32, #tpu.memory_space<vmem>>, %arg4: memref<256x256xbf16, #tpu.memory_space<vmem>>, %arg5: memref<1x256xf32, #tpu.memory_space<vmem>>, %arg6: memref<1x256xf32, #tpu.memory_space<vmem>>, %arg7: memref<1x1xf32, #tpu.memory_space<smem>>, %arg8: memref<3x4xf32, #tpu.memory_space<vmem>>) attributes {dimension_semantics = [#tpu.dimension_semantics<parallel>], iteration_bounds = array<i64: 1>, scalar_prefetch = 0 : i64, scratch_operands = 0 : i64, tpu.core_type = #tpu.core_type<tc>, window_params = [{transform_indices = @transform_0, window_bounds = array<i64: 3, 64>}, {pipeline_mode = #tpu.pipeline_mode<synchronous>, transform_indices = @transform_1, window_bounds = array<i64: 64, 256>}, {pipeline_mode = #tpu.pipeline_mode<synchronous>, transform_indices = @transform_2, window_bounds = array<i64: 1, 256>}, {pipeline_mode = #tpu.pipeline_mode<synchronous>, transform_indices = @transform_3, window_bounds = array<i64: 256, 256>}, {pipeline_mode = #tpu.pipeline_mode<synchronous>, transform_indices = @transform_4, window_bounds = array<i64: 1, 256>}, {pipeline_mode = #tpu.pipeline_mode<synchronous>, transform_indices = @transform_5, window_bounds = array<i64: 1, 256>}, {transform_indices = @transform_6, window_bounds = array<i64: 1, 1>}, {transform_indices = @transform_7, window_bounds = array<i64: 3, 4>}]} {
    %c0 = arith.constant 0 : index
    %c0_0 = arith.constant 0 : index
    %0 = vector.load %arg1[%c0, %c0_0] : memref<3x64xf32, #tpu.memory_space<vmem>>, vector<3x64xf32>
    %1 = arith.truncf %0 : vector<3x64xf32> to vector<3x64xbf16>
    %c0_1 = arith.constant 0 : index
    %c0_2 = arith.constant 0 : index
    %2 = vector.load %arg2[%c0_1, %c0_2] : memref<64x256xbf16, #tpu.memory_space<vmem>>, vector<64x256xbf16>
    %cst = arith.constant dense<0.000000e+00> : vector<3x256xf32>
    %3 = tpu.matmul %1, %2, %cst {dimension_numbers = #tpu.dot_dimension_numbers<[1], [0], [0], [1], [0, 0, 1, 1], [], []>} : vector<3x64xbf16>, vector<64x256xbf16>, vector<3x256xf32> -> vector<3x256xf32>
    %c0_3 = arith.constant 0 : index
    %c0_4 = arith.constant 0 : index
    %4 = vector.load %arg3[%c0_3, %c0_4] : memref<1x256xf32, #tpu.memory_space<vmem>>, vector<1x256xf32>
    %5 = vector.broadcast %4 : vector<1x256xf32> to vector<3x256xf32>
    %6 = arith.addf %3, %5 : vector<3x256xf32>
    %cst_5 = arith.constant 0.000000e+00 : f32
    %7 = vector.broadcast %cst_5 : f32 to vector<3x256xf32>
    %8 = arith.maximumf %6, %7 : vector<3x256xf32>
    %9 = arith.truncf %8 : vector<3x256xf32> to vector<3x256xbf16>
    %c0_6 = arith.constant 0 : index
    %c0_7 = arith.constant 0 : index
    %10 = vector.load %arg4[%c0_6, %c0_7] : memref<256x256xbf16, #tpu.memory_space<vmem>>, vector<256x256xbf16>
    %cst_8 = arith.constant dense<0.000000e+00> : vector<3x256xf32>
    %11 = tpu.matmul %9, %10, %cst_8 {dimension_numbers = #tpu.dot_dimension_numbers<[1], [0], [0], [1], [0, 0, 1, 1], [], []>} : vector<3x256xbf16>, vector<256x256xbf16>, vector<3x256xf32> -> vector<3x256xf32>
    %c0_9 = arith.constant 0 : index
    %c0_10 = arith.constant 0 : index
    %12 = vector.load %arg5[%c0_9, %c0_10] : memref<1x256xf32, #tpu.memory_space<vmem>>, vector<1x256xf32>
    %13 = vector.broadcast %12 : vector<1x256xf32> to vector<3x256xf32>
    %14 = arith.addf %11, %13 : vector<3x256xf32>
    %cst_11 = arith.constant 0.000000e+00 : f32
    %15 = vector.broadcast %cst_11 : f32 to vector<3x256xf32>
    %16 = arith.maximumf %14, %15 : vector<3x256xf32>
    %c0_12 = arith.constant 0 : index
    %c0_13 = arith.constant 0 : index
    %17 = vector.load %arg6[%c0_12, %c0_13] : memref<1x256xf32, #tpu.memory_space<vmem>>, vector<1x256xf32>
    %18 = vector.broadcast %17 : vector<1x256xf32> to vector<3x256xf32>
    %19 = arith.mulf %16, %18 : vector<3x256xf32>
    %20 = vector.extract_strided_slice %19 {offsets = [0, 0], sizes = [3, 64], strides = [1, 1]} : vector<3x256xf32> to vector<3x64xf32>
    %cst_14 = arith.constant dense<0.000000e+00> : vector<3xf32>
    %21 = vector.multi_reduction <add>, %20, %cst_14 [1] : vector<3x64xf32> to vector<3xf32>
    %22 = vector.shape_cast %21 : vector<3xf32> to vector<3x1xf32>
    %23 = vector.extract_strided_slice %19 {offsets = [0, 64], sizes = [3, 64], strides = [1, 1]} : vector<3x256xf32> to vector<3x64xf32>
    %cst_15 = arith.constant dense<0.000000e+00> : vector<3xf32>
    %24 = vector.multi_reduction <add>, %23, %cst_15 [1] : vector<3x64xf32> to vector<3xf32>
    %25 = vector.shape_cast %24 : vector<3xf32> to vector<3x1xf32>
    %26 = vector.extract_strided_slice %19 {offsets = [0, 128], sizes = [3, 64], strides = [1, 1]} : vector<3x256xf32> to vector<3x64xf32>
    %cst_16 = arith.constant dense<0.000000e+00> : vector<3xf32>
    %27 = vector.multi_reduction <add>, %26, %cst_16 [1] : vector<3x64xf32> to vector<3xf32>
    %28 = vector.shape_cast %27 : vector<3xf32> to vector<3x1xf32>
    %29 = vector.extract_strided_slice %19 {offsets = [0, 192], sizes = [3, 64], strides = [1, 1]} : vector<3x256xf32> to vector<3x64xf32>
    %cst_17 = arith.constant dense<0.000000e+00> : vector<3xf32>
    %30 = vector.multi_reduction <add>, %29, %cst_17 [1] : vector<3x64xf32> to vector<3xf32>
    %31 = vector.shape_cast %30 : vector<3xf32> to vector<3x1xf32>
    %32 = tpu.concatenate %22, %25, %28, %31 in 1 : vector<3x1xf32>, vector<3x1xf32>, vector<3x1xf32>, vector<3x1xf32> -> vector<3x4xf32>
    %c0_18 = arith.constant 0 : index
    %c0_19 = arith.constant 0 : index
    %33 = memref.load %arg7[%c0_18, %c0_19] : memref<1x1xf32, #tpu.memory_space<smem>>
    %34 = vector.broadcast %33 : f32 to vector<3x4xf32>
    %35 = arith.addf %32, %34 : vector<3x4xf32>
    %c0_20 = arith.constant 0 : index
    %c0_21 = arith.constant 0 : index
    %36 = vector.load %arg8[%c0_20, %c0_21] : memref<3x4xf32, #tpu.memory_space<vmem>>, vector<3x4xf32>
    tpu.vector_store %arg8[%c0_20, %c0_21], %35 {strides = array<i32>} : memref<3x4xf32, #tpu.memory_space<vmem>>, vector<3x4xf32>,
    return
  }
  func.func @transform_0(%arg0: i32) -> (i32, i32) {
    %c0_i32 = arith.constant 0 : i32
    %c0_i32_0 = arith.constant 0 : i32
    return %arg0, %c0_i32 : i32, i32
  }
  func.func @transform_1(%arg0: i32) -> (i32, i32) {
    %c0_i32 = arith.constant 0 : i32
    %c0_i32_0 = arith.constant 0 : i32
    %c0_i32_1 = arith.constant 0 : i32
    return %c0_i32, %c0_i32_0 : i32, i32
  }
  func.func @transform_2(%arg0: i32) -> (i32, i32) {
    %c0_i32 = arith.constant 0 : i32
    %c0_i32_0 = arith.constant 0 : i32
    %c0_i32_1 = arith.constant 0 : i32
    return %c0_i32, %c0_i32_0 : i32, i32
  }
  func.func @transform_3(%arg0: i32) -> (i32, i32) {
    %c0_i32 = arith.constant 0 : i32
    %c0_i32_0 = arith.constant 0 : i32
    %c0_i32_1 = arith.constant 0 : i32
    return %c0_i32, %c0_i32_0 : i32, i32
  }
  func.func @transform_4(%arg0: i32) -> (i32, i32) {
    %c0_i32 = arith.constant 0 : i32
    %c0_i32_0 = arith.constant 0 : i32
    %c0_i32_1 = arith.constant 0 : i32
    return %c0_i32, %c0_i32_0 : i32, i32
  }
  func.func @transform_5(%arg0: i32) -> (i32, i32) {
    %c0_i32 = arith.constant 0 : i32
    %c0_i32_0 = arith.constant 0 : i32
    %c0_i32_1 = arith.constant 0 : i32
    return %c0_i32, %c0_i32_0 : i32, i32
  }
  func.func @transform_6(%arg0: i32) -> (i32, i32) {
    %c0_i32 = arith.constant 0 : i32
    %c0_i32_0 = arith.constant 0 : i32
    %c0_i32_1 = arith.constant 0 : i32
    return %c0_i32, %c0_i32_0 : i32, i32
  }
  func.func @transform_7(%arg0: i32) -> (i32, i32) {
    %c0_i32 = arith.constant 0 : i32
    %c0_i32_0 = arith.constant 0 : i32
    return %arg0, %c0_i32 : i32, i32
  }
}

</mosaic_0001>

<bundles_post_ra>
// kernel: tpu_custom_call.1
= control target key start
LH: loop header
LB: loop body
LE: loop exit
PB: predicated region body
PF: predicated region fallthrough
CT: control target
= control target key end

     0   :  { %13 = vsyncpa [#allocation4], 0  ;;  %s862_s0 = inlined_call_operand.hbm [shape: f32[3,64], index: 0, kind: input, shape index: {}]   ;;  %s863_s1 = inlined_call_operand.hbm [shape: bf16[64,256], index: 1, kind: input, shape index: {}]   ;;  %s864_s2 = inlined_call_operand.vmem [shape: f32[1,256], index: 2, kind: input, shape index: {}]   ;;  %s865_s3 = inlined_call_operand.hbm [shape: bf16[256,256], index: 3, kind: input, shape index: {}]   ;;  %s866_s4 = inlined_call_operand.vmem [shape: f32[1,256], index: 4, kind: input, shape index: {}]   ;;  %s867_s5 = inlined_call_operand.vmem [shape: f32[1,256], index: 5, kind: input, shape index: {}]   ;;  %s868_s6 = inlined_call_operand.<no memory space> [shape: f32[1,1], index: 6, kind: input, shape index: {}]   ;;  %s869_s7 = inlined_call_operand.hbm [shape: f32[3,4], index: 7, kind: output, shape index: {}]  }
   0x1   :  { %14 = vsyncpa [#allocation7], 0  ;;  %s31_s26 = sshll.u32 %s863_s1, 4  ;;  %s32_s26 = int_to_ptr.hbm [resolvable:$true] %s31_s26 }
   0x2   :  { %15 = vsyncpa [#allocation5], 0  ;;  %s785_s27 = smov [#allocation6]   ;;  %s21_s8 = sshll.u32 %s862_s0, 4  ;;  %s22_s8 = int_to_ptr.hbm [resolvable:$true] %s21_s8 }
   0x3   :  { %s33_s28 = sshll.u32 %s785_s27, 4  ;;  %s786_s9 = smov 128   ;;  %s34_s28 = int_to_ptr.vmem [resolvable:$true] %s33_s28 }
   0x4   :  { %s787_s10 = smov 8   ;;  %s788_s11 = smov [#allocation3]  }
   0x5   :  { %39 = dma.hbm_to_vmem [thread:$0]  %s32_s26, 1024, %s34_s28, [#allocation7], %s786_s9, %s786_s9, %s787_s10  }
   0x6   :  { %s23_s12 = sshll.u32 %s788_s11, 4  ;;  %s46_s15 = sshll.u32 %s865_s3, 4  ;;  %s24_s12 = int_to_ptr.vmem [resolvable:$true] %s23_s12  ;;  %s47_s15 = int_to_ptr.hbm [resolvable:$true] %s46_s15 }
   0x7   :  { %26 = dma.hbm_to_vmem [thread:$0]  %s22_s8, 64, %s24_s12, [#allocation4]  }
   0x8   :  { %s789_s1 = smov [#allocation8]  }
   0x9   :  { %s48_s16 = sshll.u32 %s789_s1, 4  ;;  %s49_s16 = int_to_ptr.vmem [resolvable:$true] %s48_s16 }
   0xa   :  { %54 = dma.hbm_to_vmem [thread:$0]  %s47_s15, 4096, %s49_s16, [#allocation7], %s786_s9, %s786_s9, %s787_s10  }
   0xb   :  { %779 = dma.done.wait [#allocation4], 64  }
   0xc   :  { %780 = vsyncadd [#allocation4], 4294967232 }
   0xd   :  { %781 = dma.done.wait [#allocation7], 5120  }
   0xe   :  { %782 = vsyncadd [#allocation7], 4294962176  ;;  %v500_v0 = vld [vmem:[#allocation6 + $0x30] sm:$0xf]  ;;  %v643_v1 = vld [vmem:[#allocation6 + $0x34] sm:$0xf0] }
   0xf   :  { %v642_v2 = vld [vmem:[#allocation6 + $0x34] sm:$0xf]  ;;  %v501_v3 = vor.u32 %v643_v1, %v500_v0  ;;  %v502_v4 = vld [vmem:[#allocation6 + $0x38] sm:$0xf0]  ;;  %v492_v5 = vld [vmem:[#allocation6 + $0x20] sm:$0xf] }
  0x10   :  { %v641_v6 = vld [vmem:[#allocation6 + $0x24] sm:$0xf0]  ;;  %v505_v7 = vor.u32 %v642_v2, %v502_v4  ;;  %v640_v8 = vld [vmem:[#allocation6 + $0x24] sm:$0xf]  ;;  %v494_v9 = vld [vmem:[#allocation6 + $0x28] sm:$0xf0] }
  0x11   :  { %138 = vmatpush.bf16.msra.mxu0 %v501_v3  ;;  %v493_v10 = vor.u32 %v641_v6, %v492_v5  ;;  %v497_v11 = vor.u32 %v640_v8, %v494_v9  ;;  %v484_v12 = vld [vmem:[#allocation6 + $0x10] sm:$0xf]  ;;  %v639_v13 = vld [vmem:[#allocation6 + $0x14] sm:$0xf0]  ;;  %v638_v14 = vld [vmem:[#allocation6 + $0x14] sm:$0xf] }
  0x12   :  { %151 = vmatpush.bf16.msra.mxu1 %v505_v7  ;;  %v486_v15 = vld [vmem:[#allocation6 + $0x18] sm:$0xf0]  ;;  %v566_v16 = vld [vmem:[#allocation8 + $0x70] sm:$0xf]  ;;  %v476_v17 = vld [vmem:[#allocation6] sm:$0xf]  ;;  %v485_v21 = vor.u32 %v639_v13, %v484_v12 }
  0x13   :  { %v659_v18 = vld [vmem:[#allocation8 + $0x74] sm:$0xf0]  ;;  %v630_v19 = vld [vmem:[#allocation8 + $0xf0] sm:$0xf]  ;;  %v637_v22 = vld [vmem:[#allocation6 + $0x4] sm:$0xf0]  ;;  %v489_v27 = vor.u32 %v638_v14, %v486_v15 }
  0x14   :  { %v675_v20 = vld [vmem:[#allocation8 + $0xf4] sm:$0xf0]  ;;  %v636_v23 = vld [vmem:[#allocation6 + $0x4] sm:$0xf]  ;;  %v478_v24 = vld [vmem:[#allocation6 + $0x8] sm:$0xf0]  ;;  %v567_v25 = vor.u32 %v659_v18, %v566_v16  ;;  %v477_v39 = vor.u32 %v637_v22, %v476_v17 }
  0x15   :  { %139 = vmatpush.bf16.msra.mxu0 %v493_v10  ;;  %v631_v26 = vor.u32 %v675_v20, %v630_v19  ;;  %v658_v28 = vld [vmem:[#allocation8 + $0x74] sm:$0xf]  ;;  %v558_v29 = vld [vmem:[#allocation8 + $0x60] sm:$0xf]  ;;  %v657_v30 = vld [vmem:[#allocation8 + $0x64] sm:$0xf0]  ;;  %v481_v43 = vor.u32 %v636_v23, %v478_v24 }
  0x16   :  { %152 = vmatpush.bf16.msra.mxu1 %v497_v11  ;;  %362 = vmatpush.bf16.msra.mxu2 %v567_v25  ;;  %v568_v31 = vld [vmem:[#allocation8 + $0x78] sm:$0xf0]  ;;  %v559_v32 = vor.u32 %v657_v30, %v558_v29  ;;  %v622_v33 = vld [vmem:[#allocation8 + $0xe0] sm:$0xf]  ;;  %v673_v34 = vld [vmem:[#allocation8 + $0xe4] sm:$0xf0] }
  0x17   :  { %375 = vmatpush.bf16.msra.mxu3 %v631_v26  ;;  %v74_v35 = vld [vmem:[#allocation3] sm:$0x7]  ;;  %v674_v36 = vld [vmem:[#allocation8 + $0xf4] sm:$0xf]  ;;  %v623_v38 = vor.u32 %v673_v34, %v622_v33  ;;  %v550_v40 = vld [vmem:[#allocation8 + $0x50] sm:$0xf]  ;;  %v571_v44 = vor.u32 %v658_v28, %v568_v31 }
  0x18   :  { %v632_v37 = vld [vmem:[#allocation8 + $0xf8] sm:$0xf0]  ;;  %v655_v41 = vld [vmem:[#allocation8 + $0x54] sm:$0xf0]  ;;  %v614_v42 = vld [vmem:[#allocation8 + $0xd0] sm:$0xf]  ;;  %v75_v51 = vpack.c.bf16 %v74_v35, %v74_v35 }
  0x19   :  { %140 = vmatpush.bf16.msra.mxu0 %v485_v21  ;;  %v671_v45 = vld [vmem:[#allocation8 + $0xd4] sm:$0xf0]  ;;  %v635_v46 = vor.u32 %v674_v36, %v632_v37  ;;  %v656_v47 = vld [vmem:[#allocation8 + $0x64] sm:$0xf]  ;;  %v560_v48 = vld [vmem:[#allocation8 + $0x68] sm:$0xf0]  ;;  %v551_v50 = vor.u32 %v655_v41, %v550_v40 }
  0x1a   :  { %153 = vmatpush.bf16.msra.mxu1 %v489_v27  ;;  %363 = vmatpush.bf16.msra.mxu2 %v559_v32  ;;  %v672_v49 = vld [vmem:[#allocation8 + $0xe4] sm:$0xf]  ;;  %v624_v52 = vld [vmem:[#allocation8 + $0xe8] sm:$0xf0]  ;;  %v615_v53 = vor.u32 %v671_v45, %v614_v42  ;;  %v542_v54 = vld [vmem:[#allocation8 + $0x40] sm:$0xf]  ;;  %v563_v58 = vor.u32 %v656_v47, %v560_v48 }
  0x1b   :  { %376 = vmatpush.bf16.msra.mxu3 %v623_v38  ;;  %v653_v55 = vld [vmem:[#allocation8 + $0x44] sm:$0xf0]  ;;  %vm130_vm0 = vcmask 523264   ;;  %v606_v56 = vld [vmem:[#allocation8 + $0xc0] sm:$0xf]  ;;  %v627_v59 = vor.u32 %v672_v49, %v624_v52  ;;  %vm424_vm1 = vcmask 518144  }
  0x1c   :  { %v669_v57 = vld [vmem:[#allocation8 + $0xc4] sm:$0xf0]  ;;  %v654_v60 = vld [vmem:[#allocation8 + $0x54] sm:$0xf]  ;;  %v552_v61 = vld [vmem:[#allocation8 + $0x58] sm:$0xf0]  ;;  %v543_v63 = vor.u32 %v653_v55, %v542_v54 }
  0x1d   :  { %141 = vmatpush.bf16.msra.mxu0 %v477_v39  ;;  %v670_v62 = vld [vmem:[#allocation8 + $0xd4] sm:$0xf]  ;;  %v616_v0 = vld [vmem:[#allocation8 + $0xd8] sm:$0xf0]  ;;  %v607_v1 = vor.u32 %v669_v57, %v606_v56  ;;  %v534_v2 = vld [vmem:[#allocation8 + $0x30] sm:$0xf]  ;;  %v555_v6 = vor.u32 %v654_v60, %v552_v61 }
  0x1e   :  { %154 = vmatpush.bf16.msra.mxu1 %v481_v43  ;;  %364 = vmatpush.bf16.msra.mxu2 %v551_v50  ;;  %v651_v3 = vld [vmem:[#allocation8 + $0x34] sm:$0xf0]  ;;  %v598_v4 = vld [vmem:[#allocation8 + $0xb0] sm:$0xf]  ;;  %v619_v7 = vor.u32 %v670_v62, %v616_v0  ;;  %v652_v8 = vld [vmem:[#allocation8 + $0x44] sm:$0xf] }
  0x1f   :  { %377 = vmatpush.bf16.msra.mxu3 %v615_v53  ;;  %v667_v5 = vld [vmem:[#allocation8 + $0xb4] sm:$0xf0]  ;;  %v544_v9 = vld [vmem:[#allocation8 + $0x48] sm:$0xf0]  ;;  %v668_v10 = vld [vmem:[#allocation8 + $0xc4] sm:$0xf]  ;;  %v535_v11 = vor.u32 %v651_v3, %v534_v2 }
  0x20   :  { %506 = vmatmul.msk.bf16.vlgmr.msra.gmra.mxu0 %vm130_vm0, %v75_v51  ;;  %v608_v12 = vld [vmem:[#allocation8 + $0xc8] sm:$0xf0]  ;;  %v599_v13 = vor.u32 %v667_v5, %v598_v4  ;;  %v526_v14 = vld [vmem:[#allocation8 + $0x20] sm:$0xf]  ;;  %v649_v15 = vld [vmem:[#allocation8 + $0x24] sm:$0xf0]  ;;  %v547_v18 = vor.u32 %v652_v8, %v544_v9 }
  0x21   :  { %388 = vmatpush.bf16.msrb.mxu0 %v571_v44  ;;  %507 = vmatmul.msk.bf16.vlgmr.msra.gmra.mxu1 %vm130_vm0, %v75_v51  ;;  %v590_v16 = vld [vmem:[#allocation8 + $0xa0] sm:$0xf]  ;;  %v665_v17 = vld [vmem:[#allocation8 + $0xa4] sm:$0xf0]  ;;  %v611_v19 = vor.u32 %v668_v10, %v608_v12  ;;  %v650_v20 = vld [vmem:[#allocation8 + $0x34] sm:$0xf]  ;;  %v527_v22 = vor.u32 %v649_v15, %v526_v14 }
  0x22   :  { %401 = vmatpush.bf16.msrb.mxu1 %v635_v46  ;;  %365 = vmatpush.bf16.msra.mxu2 %v543_v63  ;;  %v536_v21 = vld [vmem:[#allocation8 + $0x38] sm:$0xf0]  ;;  %v666_v23 = vld [vmem:[#allocation8 + $0xb4] sm:$0xf]  ;;  %v591_v25 = vor.u32 %v665_v17, %v590_v16  ;;  %v648_v28 = vld [vmem:[#allocation8 + $0x24] sm:$0xf] }
  0x23   :  { %378 = vmatpush.bf16.msra.mxu3 %v607_v1  ;;  %v600_v24 = vld [vmem:[#allocation8 + $0xb8] sm:$0xf0]  ;;  %v539_v26 = vor.u32 %v650_v20, %v536_v21  ;;  %v528_v29 = vld [vmem:[#allocation8 + $0x28] sm:$0xf0]  ;;  %v664_v30 = vld [vmem:[#allocation8 + $0xa4] sm:$0xf] }
  0x24   :  { %v603_v27 = vor.u32 %v666_v23, %v600_v24  ;;  %v592_v31 = vld [vmem:[#allocation8 + $0xa8] sm:$0xf0]  ;;  %v531_v32 = vor.u32 %v648_v28, %v528_v29  ;;  %v518_v34 = vld [vmem:[#allocation8 + $0x10] sm:$0xf]  ;;  %v647_v35 = vld [vmem:[#allocation8 + $0x14] sm:$0xf0] }
  0x25   :  { %389 = vmatpush.bf16.msrb.mxu0 %v563_v58  ;;  %v595_v33 = vor.u32 %v664_v30, %v592_v31  ;;  %v582_v36 = vld [vmem:[#allocation8 + $0x90] sm:$0xf]  ;;  %v519_v37 = vor.u32 %v647_v35, %v518_v34  ;;  %v663_v38 = vld [vmem:[#allocation8 + $0x94] sm:$0xf0]  ;;  %v646_v39 = vld [vmem:[#allocation8 + $0x14] sm:$0xf] }
  0x26   :  { %402 = vmatpush.bf16.msrb.mxu1 %v627_v59  ;;  %366 = vmatpush.bf16.msra.mxu2 %v535_v11  ;;  %v520_v40 = vld [vmem:[#allocation8 + $0x18] sm:$0xf0]  ;;  %v583_v41 = vor.u32 %v663_v38, %v582_v36  ;;  %v662_v43 = vld [vmem:[#allocation8 + $0x94] sm:$0xf]  ;;  %v510_v46 = vld [vmem:[#allocation8] sm:$0xf] }
  0x27   :  { %379 = vmatpush.bf16.msra.mxu3 %v599_v13  ;;  %v523_v42 = vor.u32 %v646_v39, %v520_v40  ;;  %v584_v44 = vld [vmem:[#allocation8 + $0x98] sm:$0xf0]  ;;  %v645_v47 = vld [vmem:[#allocation8 + $0x4] sm:$0xf0]  ;;  %v574_v48 = vld [vmem:[#allocation8 + $0x80] sm:$0xf]  ;;  %v452_v39 = vstv %s868_s6 }
  0x28   :  { %v587_v45 = vor.u32 %v662_v43, %v584_v44  ;;  %v511_v49 = vor.u32 %v645_v47, %v510_v46  ;;  %v661_v50 = vld [vmem:[#allocation8 + $0x84] sm:$0xf0]  ;;  %v644_v51 = vld [vmem:[#allocation8 + $0x4] sm:$0xf]  ;;  %v512_v52 = vld [vmem:[#allocation8 + $0x8] sm:$0xf0] }
  0x29   :  { %390 = vmatpush.bf16.msrb.mxu0 %v555_v6  ;;  %v575_v53 = vor.u32 %v661_v50, %v574_v48  ;;  %v515_v54 = vor.u32 %v644_v51, %v512_v52  ;;  %v660_v55 = vld [vmem:[#allocation8 + $0x84] sm:$0xf]  ;;  %v576_v56 = vld [vmem:[#allocation8 + $0x88] sm:$0xf0]  ;;  %v84_v58 = vld [vmem:[%s864_s2] sm:$0x3] }
  0x2a   :  { %403 = vmatpush.bf16.msrb.mxu1 %v619_v7  ;;  %367 = vmatpush.bf16.msra.mxu2 %v527_v22  ;;  %v579_v57 = vor.u32 %v660_v55, %v576_v56  ;;  %v86_v59 = vperm.slane %v84_v58, 0  ;;  %v87_v60 = vperm.slane %v84_v58, 1  ;;  %v196_v7 = vld [vmem:[%s866_s4] sm:$0x3]  ;;  %s790_s4 = smov 64   ;;  %vm445_vm2 = vcmask 7168  }
  0x2b   :  { %380 = vmatpush.bf16.msra.mxu3 %v591_v25  ;;  %v199_v8 = vperm.slane %v196_v7, 1  ;;  %v416_v10 = vld [vmem:[%s867_s5] sm:$0x3]  ;;  %v198_v14 = vperm.slane %v196_v7, 0  ;;  %vm447_vm3 = vcmask 15360   ;;  %vm449_vm4 = vcmask 23552  }
  0x2c   :  { %v419_v15 = vperm.slane %v416_v10, 1  ;;  %v418_v25 = vperm.slane %v416_v10, 0  ;;  %s791_s21 = smov [#allocation9]   ;;  %s463_s25 = sshll.u32 %s869_s7, 4  ;;  %vm454_vm5 = vcmask 26624   ;;  %s464_s25 = int_to_ptr.hbm [resolvable:$true] %s463_s25 }
  0x2d   :  { %391 = vmatpush.bf16.msrb.mxu0 %v547_v18  ;;  %s461_s22 = sshll.u32 %s791_s21, 4  ;;  %s462_s22 = int_to_ptr.vmem [resolvable:$true] %s461_s22 }
  0x2e   :  { %404 = vmatpush.bf16.msrb.mxu1 %v611_v19  ;;  %368 = vmatpush.bf16.msra.mxu2 %v519_v37 }
  0x2f   :  { %381 = vmatpush.bf16.msra.mxu3 %v583_v41 }
  0x31   :  { %392 = vmatpush.bf16.msrb.mxu0 %v539_v26 }
  0x32   :  { %405 = vmatpush.bf16.msrb.mxu1 %v603_v27  ;;  %369 = vmatpush.bf16.msra.mxu2 %v511_v49 }
  0x33   :  { %382 = vmatpush.bf16.msra.mxu3 %v575_v53 }
  0x35   :  { %393 = vmatpush.bf16.msrb.mxu0 %v531_v32 }
  0x36   :  { %406 = vmatpush.bf16.msrb.mxu1 %v595_v33 }
  0x39   :  { %394 = vmatpush.bf16.msrb.mxu0 %v523_v42 }
  0x3a   :  { %407 = vmatpush.bf16.msrb.mxu1 %v587_v45 }
  0x3d   :  { %395 = vmatpush.bf16.msrb.mxu0 %v515_v54 }
  0x3e   :  { %408 = vmatpush.bf16.msrb.mxu1 %v579_v57 }
  0x9d   :  { %v143_v61 = vpop.f32.mrf.mxu0 }
  0x9e   :  { %v144_v62 = vadd.f32 %v143_v61, %v86_v59  ;;  %v156_v63 = vpop.f32.mrf.mxu1 }
  0x9f   :  { %v157_v0 = vadd.f32 %v156_v63, %v87_v60 }
  0xa0   :  { %v160_v1 = vmax.f32 %v144_v62, 0.0 }
  0xa1   :  { %v161_v2 = vmax.f32 %v157_v0, 0.0 }
  0xa2   :  { %v162_v3 = vpack.c.bf16 %v160_v1, %v160_v1 }
  0xa3   :  { %v163_v4 = vpack.c.bf16 %v161_v2, %v161_v2 }
  0xa4   :  { %370 = vmatmul.bf16.vlgmr.msra.gmra.mxu2 %v162_v3  ;;  %396 = vmatmul.bf16.vlgmr.msrb.gmra.mxu0 %v162_v3 }
  0xa5   :  { %383 = vmatmul.bf16.vlgmr.msra.gmra.mxu3 %v163_v4  ;;  %409 = vmatmul.bf16.vlgmr.msrb.gmra.mxu1 %v163_v4  ;;  %v145_v5 = vpop.f32.mrf.mxu0 }
  0xa6   :  { %v158_v6 = vpop.f32.mrf.mxu1 }
 0x121   :  { %v397_v9 = vpop.f32.mrf.mxu0 }
 0x122   :  { %v398_v11 = vadd.f32 %v397_v9, %v199_v8  ;;  %v410_v12 = vpop.f32.mrf.mxu1 }
 0x124   :  { %v411_v13 = vadd.f32 %v410_v12, %v398_v11 }
 0x126   :  { %v415_v16 = vmax.f32 %v411_v13, 0.0 }
 0x127   :  { %v371_v17 = vpop.f32.mrf.mxu2 }
 0x128   :  { %v372_v18 = vadd.f32 %v371_v17, %v198_v14  ;;  %v384_v19 = vpop.f32.mrf.mxu3  ;;  %v423_v20 = vmul.f32 %v419_v15, %v415_v16 }
 0x129   :  { %v399_v21 = vpop.f32.mrf.mxu0 }
 0x12a   :  { %v385_v22 = vadd.f32 %v384_v19, %v372_v18  ;;  %v412_v23 = vpop.f32.mrf.mxu1  ;;  %v435_v24 = vsel %vm424_vm1, %v423_v20, 0.0 }
 0x12b   :  { %436 = vadd.xlane.f32.xlu2 %v435_v24 }
 0x12c   :  { %v414_v26 = vmax.f32 %v385_v22, 0.0 }
 0x12e   :  { %v422_v27 = vmul.f32 %v418_v25, %v414_v26 }
 0x12f   :  { %v373_v28 = vpop.f32.mrf.mxu2 }
 0x130   :  { %v386_v29 = vpop.f32.mrf.mxu3  ;;  %429 = vrot.lane.b32.xlu0 %v422_v27, %s790_s4  ;;  %v425_v30 = vsel %vm424_vm1, %v422_v27, 0.0 }
 0x131   :  { %426 = vadd.xlane.f32.xlu1 %v425_v30 }
 0x138   :  { %439 = vrot.lane.b32.xlu0 %v423_v20, %s790_s4 }
 0x19e   :  { %v437_v36 = vpop.xlane.xlu2 %436 }
 0x1a2   :  { %v430_v31 = vpop.permute.xlu0 %429 }
 0x1a3   :  { %v432_v32 = vsel %vm424_vm1, %v430_v31, 0.0 }
 0x1a4   :  { %433 = vadd.xlane.f32.xlu1 %v432_v32  ;;  %v427_v35 = vpop.xlane.xlu1 %426 }
 0x1aa   :  { %v440_v33 = vpop.permute.xlu0 %439 }
 0x1ab   :  { %v442_v34 = vsel %vm424_vm1, %v440_v33, 0.0 }
 0x1ac   :  { %443 = vadd.xlane.f32.xlu2 %v442_v34 }
 0x217   :  { %v434_v37 = vpop.xlane.xlu1 %433 }
 0x218   :  { %v446_v38 = vsel %vm445_vm2, %v427_v35, %v434_v37 }
 0x219   :  { %v448_v41 = vsel %vm447_vm3, %v446_v38, %v437_v36 }
 0x21f   :  { %v444_v40 = vpop.xlane.xlu2 %443 }
 0x220   :  { %v450_v42 = vsel %vm449_vm4, %v448_v41, %v444_v40 }
 0x221   :  { %v453_v43 = vadd.f32 %v452_v39, %v450_v42 }
 0x223   :  { %455 = vst.msk [vmem:[#allocation9] sm:$0x7] %vm454_vm5, %v453_v43 }
 0x224   :  { %466 = dma.vmem_to_hbm [thread:$0]  %s462_s22, 64, %s464_s25, [#allocation5]  }
 0x225   :  { %783 = dma.done.wait [#allocation5], 64  }
 0x226   :  { %784 = vsyncadd [#allocation5], 4294967232 }
 0x227   :  { %471 = vsyncpa [#allocation4], 1 }
 0x228   :  { %472 = vsyncpa [#allocation7], 1 }
 0x229   :  { %473 = vsyncpa [#allocation5], 1 }

</bundles_post_ra>
